<compile_context>
chip_gen: v7x
topology: tpu7x:2x2x1
jax: 0.10.0
libtpu: 0.0.40
codegen_flags: <defaults>
</compile_context>

<pallas_src>
import math

import jax
import jax.numpy as jnp
from jax import lax
from jax.experimental import pallas as pl
from jax.experimental.pallas import tpu as pltpu


def _attention_kernel(xq_ref, xk_ref, wq_ref, wkv_ref, bq_ref, bkv_ref,
                      o_ref, q_scratch, acc_scratch):
    """One (batch, q-tile, k-tile) grid step.

    xq_ref : (1, TQ, H)  query-row slice of x
    xk_ref : (1, TK, H)  key/value-row slice of x
    wq_ref : (H, H)      query weight, pre-transposed to (in, out)
    wkv_ref: (H, 2H)     fused [Wk | Wv] weight, pre-transposed to (in, out)
    bq_ref : (1, H)      bkv_ref: (1, 2H)
    o_ref  : (1, TQ, H)
    q_scratch / acc_scratch : (TQ, H) float32 VMEM scratch.
    """
    H = xq_ref.shape[-1]
    ki = pl.program_id(2)
    scale = 1.0 / math.sqrt(H)

    # Query projection: computed once per (batch, q-tile) at the first k step.
    # The 1/sqrt(H) scale is folded into q so the (TQ, TK) scores need no
    # separate VPU scaling pass.
    @pl.when(ki == 0)
    def _():
        q = jnp.dot(xq_ref[0], wq_ref[...],
                    preferred_element_type=jnp.float32)            # (TQ, H)
        q_scratch[...] = (q + bq_ref[...].astype(jnp.float32)) * scale
        acc_scratch[...] = jnp.zeros_like(acc_scratch)

    # Fused key/value projection for this k-tile: one (TK,H)x(H,2H) matmul in
    # the inputs' native dtype, accumulated in f32 on the MXU.
    kv = jnp.dot(xk_ref[0], wkv_ref[...],
                 preferred_element_type=jnp.float32)                # (TK, 2H)
    kv = kv + bkv_ref[...].astype(jnp.float32)
    k = kv[:, :H]                                                   # (TK, H)
    v = kv[:, H:]                                                   # (TK, H)

    # scores = q @ k^T expressed as an NT contraction (no in-kernel transpose).
    scores = lax.dot_general(
        q_scratch[...], k,
        dimension_numbers=(((1,), (1,)), ((), ())),
        preferred_element_type=jnp.float32)                         # (TQ, TK)

    # context accumulation over k-tiles (no softmax, per the reference).
    acc_scratch[...] += jnp.dot(scores, v,
                                preferred_element_type=jnp.float32)

    @pl.when(ki == pl.num_programs(2) - 1)
    def _():
        o_ref[0] = acc_scratch[...].astype(o_ref.dtype)


def _pick_tile(S, target=256):
    """Largest multiple-of-8 divisor of S that is <= target (else S itself)."""
    if S <= target:
        return S
    for t in range(target - target % 8, 7, -8):
        if S % t == 0:
            return t
    return S


def self_attention_pallas(x, wq, bq, wk, bk, wv, bv, *, tq=None, tk=None):
    B, S, H = x.shape
    tq = tq or _pick_tile(S)
    tk = tk or _pick_tile(S)
    nq = S // tq
    nk = S // tk

    # Pre-transpose weights to (in, out) layout and fuse K/V so the kernel
    # never transposes on-chip and does one wide projection per k-tile.
    wq_t = wq.T                                            # (H, H)
    wkv_t = jnp.concatenate([wk.T, wv.T], axis=1)          # (H, 2H)
    bq2 = bq.reshape(1, H)
    bkv = jnp.concatenate([bk, bv]).reshape(1, 2 * H)

    # Advisory cost hint for XLA's scheduler around the custom call.
    flops = 2 * B * S * H * (3 * H + 2 * S)
    bytes_accessed = (2 * x.size * x.dtype.itemsize
                      + (wq_t.size + wkv_t.size + bq2.size + bkv.size)
                      * x.dtype.itemsize
                      + B * S * H * x.dtype.itemsize)

    return pl.pallas_call(
        _attention_kernel,
        out_shape=jax.ShapeDtypeStruct((B, S, H), x.dtype),
        grid=(B, nq, nk),
        in_specs=[
            pl.BlockSpec((1, tq, H), lambda b, qi, ki: (b, qi, 0)),  # x (q rows)
            pl.BlockSpec((1, tk, H), lambda b, qi, ki: (b, ki, 0)),  # x (k rows)
            pl.BlockSpec((H, H), lambda b, qi, ki: (0, 0)),          # Wq^T
            pl.BlockSpec((H, 2 * H), lambda b, qi, ki: (0, 0)),      # [Wk|Wv]^T
            pl.BlockSpec((1, H), lambda b, qi, ki: (0, 0)),          # bq
            pl.BlockSpec((1, 2 * H), lambda b, qi, ki: (0, 0)),      # [bk|bv]
        ],
        out_specs=pl.BlockSpec((1, tq, H), lambda b, qi, ki: (b, qi, 0)),
        scratch_shapes=[
            pltpu.VMEM((tq, H), jnp.float32),   # scaled q tile, reused over k
            pltpu.VMEM((tq, H), jnp.float32),   # context accumulator
        ],
        compiler_params=pltpu.CompilerParams(
            dimension_semantics=("parallel", "parallel", "arbitrary")),
        cost_estimate=pl.CostEstimate(
            flops=flops, transcendentals=0, bytes_accessed=bytes_accessed),
    )(x, x, wq_t, wkv_t, bq2, bkv)


def _reference(x, wq, bq, wk, bk, wv, bv):
    # Pure-JAX reference mirroring the (intended) PyTorch forward.
    q = jnp.einsum("bsh,oh->bso", x, wq) + bq
    k = jnp.einsum("bsh,oh->bso", x, wk) + bk
    v = jnp.einsum("bsh,oh->bso", x, wv) + bv
    scale = 1.0 / math.sqrt(x.shape[-1])
    scores = jnp.einsum("bqh,bkh->bqk", q, k) * scale
    return jnp.einsum("bqk,bkh->bqh", scores, v)


def _init_linear(key, fan_in, fan_out, dtype=jnp.float32):
    # Deterministic nn.Linear-style init: U(-1/sqrt(fan_in), 1/sqrt(fan_in)).
    kw, kb = jax.random.split(key)
    bound = 1.0 / math.sqrt(fan_in)
    w = jax.random.uniform(kw, (fan_out, fan_in), dtype, -bound, bound)
    b = jax.random.uniform(kb, (fan_out,), dtype, -bound, bound)
    return w, b


if __name__ == "__main__":
    # Small shapes consistent with the module: (batch, seq, hidden).
    B, S, H = 2, 8, 32

    key = jax.random.PRNGKey(0)
    kx, kq, kk, kv = jax.random.split(key, 4)

    x = jax.random.normal(kx, (B, S, H), jnp.float32)
    wq, bq = _init_linear(kq, H, H)
    wk, bk = _init_linear(kk, H, H)
    wv, bv = _init_linear(kv, H, H)

    out = self_attention_pallas(x, wq, bq, wk, bk, wv, bv)
    out = jax.block_until_ready(out)

    ref = _reference(x, wq, bq, wk, bk, wv, bv)
    assert out.shape == (B, S, H)
    assert jnp.allclose(out, ref, atol=1e-4, rtol=1e-4), "mismatch vs reference"

    print("KERNEL_OK")
</pallas_src>

<mosaic_0001>
module attributes {stable_mosaic.version = 11 : i64} {
  func.func @_attention_kernel(%arg0: i32, %arg1: i32, %arg2: i32, %arg3: memref<1x8x32xf32, #tpu.memory_space<vmem>>, %arg4: memref<1x8x32xf32, #tpu.memory_space<vmem>>, %arg5: memref<32x32xf32, #tpu.memory_space<vmem>>, %arg6: memref<32x64xf32, #tpu.memory_space<vmem>>, %arg7: memref<1x32xf32, #tpu.memory_space<vmem>>, %arg8: memref<1x64xf32, #tpu.memory_space<vmem>>, %arg9: memref<1x8x32xf32, #tpu.memory_space<vmem>>, %arg10: memref<8x32xf32, #tpu.memory_space<vmem>>, %arg11: memref<8x32xf32, #tpu.memory_space<vmem>>) attributes {dimension_semantics = [#tpu.dimension_semantics<parallel>, #tpu.dimension_semantics<parallel>, #tpu.dimension_semantics<arbitrary>], iteration_bounds = array<i64: 2, 1, 1>, scalar_prefetch = 0 : i64, scratch_operands = 2 : i64, tpu.core_type = #tpu.core_type<tc>, window_params = [{transform_indices = @transform_0, window_bounds = array<i64: 1, 8, 32>}, {transform_indices = @transform_1, window_bounds = array<i64: 1, 8, 32>}, {pipeline_mode = #tpu.pipeline_mode<synchronous>, transform_indices = @transform_2, window_bounds = array<i64: 32, 32>}, {pipeline_mode = #tpu.pipeline_mode<synchronous>, transform_indices = @transform_3, window_bounds = array<i64: 32, 64>}, {pipeline_mode = #tpu.pipeline_mode<synchronous>, transform_indices = @transform_4, window_bounds = array<i64: 1, 32>}, {pipeline_mode = #tpu.pipeline_mode<synchronous>, transform_indices = @transform_5, window_bounds = array<i64: 1, 64>}, {transform_indices = @transform_6, window_bounds = array<i64: 1, 8, 32>}]} {
    %c0_i32 = arith.constant 0 : i32
    %0 = arith.cmpi eq, %arg2, %c0_i32 : i32
    %1 = arith.extui %0 : i1 to i32
    %c0_i32_0 = arith.constant 0 : i32
    %2 = arith.cmpi ne, %1, %c0_i32_0 : i32
    scf.if %2 {
      %c0_17 = arith.constant 0 : index
      %c0_18 = arith.constant 0 : index
      %c0_19 = arith.constant 0 : index
      %21 = vector.load %arg3[%c0_17, %c0_18, %c0_19] : memref<1x8x32xf32, #tpu.memory_space<vmem>>, vector<1x8x32xf32>
      %22 = vector.shape_cast %21 : vector<1x8x32xf32> to vector<8x32xf32>
      %c0_20 = arith.constant 0 : index
      %c0_21 = arith.constant 0 : index
      %23 = vector.load %arg5[%c0_20, %c0_21] : memref<32x32xf32, #tpu.memory_space<vmem>>, vector<32x32xf32>
      %cst_22 = arith.constant dense<0.000000e+00> : vector<8x32xf32>
      %24 = tpu.matmul %22, %23, %cst_22 {dimension_numbers = #tpu.dot_dimension_numbers<[1], [0], [0], [1], [0, 0, 1, 1], [], []>} : vector<8x32xf32>, vector<32x32xf32>, vector<8x32xf32> -> vector<8x32xf32>
      %c0_23 = arith.constant 0 : index
      %c0_24 = arith.constant 0 : index
      %25 = vector.load %arg7[%c0_23, %c0_24] : memref<1x32xf32, #tpu.memory_space<vmem>>, vector<1x32xf32>
      %26 = vector.broadcast %25 : vector<1x32xf32> to vector<8x32xf32>
      %27 = arith.addf %24, %26 : vector<8x32xf32>
      %cst_25 = arith.constant 0.176776692 : f32
      %28 = vector.broadcast %cst_25 : f32 to vector<8x32xf32>
      %29 = arith.mulf %27, %28 : vector<8x32xf32>
      %c0_26 = arith.constant 0 : index
      %c0_27 = arith.constant 0 : index
      %30 = vector.load %arg10[%c0_26, %c0_27] : memref<8x32xf32, #tpu.memory_space<vmem>>, vector<8x32xf32>
      tpu.vector_store %arg10[%c0_26, %c0_27], %29 {strides = array<i32>} : memref<8x32xf32, #tpu.memory_space<vmem>>, vector<8x32xf32>,
      %cst_28 = arith.constant 0.000000e+00 : f32
      %31 = vector.broadcast %cst_28 : f32 to vector<8x32xf32>
      %c0_29 = arith.constant 0 : index
      %c0_30 = arith.constant 0 : index
      %32 = vector.load %arg11[%c0_29, %c0_30] : memref<8x32xf32, #tpu.memory_space<vmem>>, vector<8x32xf32>
      tpu.vector_store %arg11[%c0_29, %c0_30], %31 {strides = array<i32>} : memref<8x32xf32, #tpu.memory_space<vmem>>, vector<8x32xf32>,
    } else {
    }
    %c0 = arith.constant 0 : index
    %c0_1 = arith.constant 0 : index
    %c0_2 = arith.constant 0 : index
    %3 = vector.load %arg4[%c0, %c0_1, %c0_2] : memref<1x8x32xf32, #tpu.memory_space<vmem>>, vector<1x8x32xf32>
    %4 = vector.shape_cast %3 : vector<1x8x32xf32> to vector<8x32xf32>
    %c0_3 = arith.constant 0 : index
    %c0_4 = arith.constant 0 : index
    %5 = vector.load %arg6[%c0_3, %c0_4] : memref<32x64xf32, #tpu.memory_space<vmem>>, vector<32x64xf32>
    %cst = arith.constant dense<0.000000e+00> : vector<8x64xf32>
    %6 = tpu.matmul %4, %5, %cst {dimension_numbers = #tpu.dot_dimension_numbers<[1], [0], [0], [1], [0, 0, 1, 1], [], []>} : vector<8x32xf32>, vector<32x64xf32>, vector<8x64xf32> -> vector<8x64xf32>
    %c0_5 = arith.constant 0 : index
    %c0_6 = arith.constant 0 : index
    %7 = vector.load %arg8[%c0_5, %c0_6] : memref<1x64xf32, #tpu.memory_space<vmem>>, vector<1x64xf32>
    %8 = vector.broadcast %7 : vector<1x64xf32> to vector<8x64xf32>
    %9 = arith.addf %6, %8 : vector<8x64xf32>
    %10 = vector.extract_strided_slice %9 {offsets = [0, 0], sizes = [8, 32], strides = [1, 1]} : vector<8x64xf32> to vector<8x32xf32>
    %11 = vector.extract_strided_slice %9 {offsets = [0, 32], sizes = [8, 32], strides = [1, 1]} : vector<8x64xf32> to vector<8x32xf32>
    %c0_7 = arith.constant 0 : index
    %c0_8 = arith.constant 0 : index
    %12 = vector.load %arg10[%c0_7, %c0_8] : memref<8x32xf32, #tpu.memory_space<vmem>>, vector<8x32xf32>
    %cst_9 = arith.constant dense<0.000000e+00> : vector<8x8xf32>
    %13 = tpu.matmul %12, %10, %cst_9 {dimension_numbers = #tpu.dot_dimension_numbers<[1], [1], [0], [0], [0, 0, 1, 0], [], []>} : vector<8x32xf32>, vector<8x32xf32>, vector<8x8xf32> -> vector<8x8xf32>
    %c0_10 = arith.constant 0 : index
    %c0_11 = arith.constant 0 : index
    %14 = vector.load %arg11[%c0_10, %c0_11] : memref<8x32xf32, #tpu.memory_space<vmem>>, vector<8x32xf32>
    %cst_12 = arith.constant dense<0.000000e+00> : vector<8x32xf32>
    %15 = tpu.matmul %13, %11, %cst_12 {dimension_numbers = #tpu.dot_dimension_numbers<[1], [0], [0], [1], [0, 0, 1, 1], [], []>} : vector<8x8xf32>, vector<8x32xf32>, vector<8x32xf32> -> vector<8x32xf32>
    %16 = arith.addf %14, %15 : vector<8x32xf32>
    %c0_13 = arith.constant 0 : index
    %c0_14 = arith.constant 0 : index
    %17 = vector.load %arg11[%c0_13, %c0_14] : memref<8x32xf32, #tpu.memory_space<vmem>>, vector<8x32xf32>
    tpu.vector_store %arg11[%c0_13, %c0_14], %16 {strides = array<i32>} : memref<8x32xf32, #tpu.memory_space<vmem>>, vector<8x32xf32>,
    %c0_i32_15 = arith.constant 0 : i32
    %18 = arith.cmpi eq, %arg2, %c0_i32_15 : i32
    %19 = arith.extui %18 : i1 to i32
    %c0_i32_16 = arith.constant 0 : i32
    %20 = arith.cmpi ne, %19, %c0_i32_16 : i32
    scf.if %20 {
      %c0_17 = arith.constant 0 : index
      %c0_18 = arith.constant 0 : index
      %21 = vector.load %arg11[%c0_17, %c0_18] : memref<8x32xf32, #tpu.memory_space<vmem>>, vector<8x32xf32>
      %c0_19 = arith.constant 0 : index
      %c0_20 = arith.constant 0 : index
      %c0_21 = arith.constant 0 : index
      %22 = vector.load %arg9[%c0_19, %c0_20, %c0_21] : memref<1x8x32xf32, #tpu.memory_space<vmem>>, vector<1x8x32xf32>
      %23 = vector.shape_cast %22 : vector<1x8x32xf32> to vector<8x32xf32>
      %24 = vector.shape_cast %21 : vector<8x32xf32> to vector<1x8x32xf32>
      tpu.vector_store %arg9[%c0_19, %c0_20, %c0_21], %24 {strides = array<i32>} : memref<1x8x32xf32, #tpu.memory_space<vmem>>, vector<1x8x32xf32>,
    } else {
    }
    return
  }
  func.func @transform_0(%arg0: i32, %arg1: i32, %arg2: i32) -> (i32, i32, i32) {
    %c0_i32 = arith.constant 0 : i32
    %c0_i32_0 = arith.constant 0 : i32
    return %arg0, %arg1, %c0_i32 : i32, i32, i32
  }
  func.func @transform_1(%arg0: i32, %arg1: i32, %arg2: i32) -> (i32, i32, i32) {
    %c0_i32 = arith.constant 0 : i32
    %c0_i32_0 = arith.constant 0 : i32
    return %arg0, %arg2, %c0_i32 : i32, i32, i32
  }
  func.func @transform_2(%arg0: i32, %arg1: i32, %arg2: i32) -> (i32, i32) {
    %c0_i32 = arith.constant 0 : i32
    %c0_i32_0 = arith.constant 0 : i32
    %c0_i32_1 = arith.constant 0 : i32
    return %c0_i32, %c0_i32_0 : i32, i32
  }
  func.func @transform_3(%arg0: i32, %arg1: i32, %arg2: i32) -> (i32, i32) {
    %c0_i32 = arith.constant 0 : i32
    %c0_i32_0 = arith.constant 0 : i32
    %c0_i32_1 = arith.constant 0 : i32
    return %c0_i32, %c0_i32_0 : i32, i32
  }
  func.func @transform_4(%arg0: i32, %arg1: i32, %arg2: i32) -> (i32, i32) {
    %c0_i32 = arith.constant 0 : i32
    %c0_i32_0 = arith.constant 0 : i32
    %c0_i32_1 = arith.constant 0 : i32
    return %c0_i32, %c0_i32_0 : i32, i32
  }
  func.func @transform_5(%arg0: i32, %arg1: i32, %arg2: i32) -> (i32, i32) {
    %c0_i32 = arith.constant 0 : i32
    %c0_i32_0 = arith.constant 0 : i32
    %c0_i32_1 = arith.constant 0 : i32
    return %c0_i32, %c0_i32_0 : i32, i32
  }
  func.func @transform_6(%arg0: i32, %arg1: i32, %arg2: i32) -> (i32, i32, i32) {
    %c0_i32 = arith.constant 0 : i32
    %c0_i32_0 = arith.constant 0 : i32
    return %arg0, %arg1, %c0_i32 : i32, i32, i32
  }
}

</mosaic_0001>

<bundles_post_ra>
// kernel: tpu_custom_call.1
= control target key start
LH: loop header
LB: loop body
LE: loop exit
PB: predicated region body
PF: predicated region fallthrough
CT: control target
= control target key end

     0   :  { %s1590_s0 = inlined_call_operand.hbm [shape: f32[2,8,32], index: 0, kind: input, shape index: {}]   ;;  %s1591_s1 = inlined_call_operand.hbm [shape: f32[2,8,32], index: 1, kind: input, shape index: {}]   ;;  %s1592_s2 = inlined_call_operand.hbm [shape: f32[32,32], index: 2, kind: input, shape index: {}]   ;;  %s1593_s3 = inlined_call_operand.hbm [shape: f32[32,64], index: 3, kind: input, shape index: {}]   ;;  %s1594_s4 = inlined_call_operand.vmem [shape: f32[1,32], index: 4, kind: input, shape index: {}]   ;;  %s1595_s5 = inlined_call_operand.vmem [shape: f32[1,64], index: 5, kind: input, shape index: {}]   ;;  %s1596_s6 = inlined_call_operand.hbm [shape: f32[2,8,32], index: 6, kind: output, shape index: {}]  }
   0x1   :  { %1603 = sst [smem:[#allocation21_spill]] %s1592_s2 }
   0x2   :  { %1604 = sst [smem:[#allocation22_spill]] %s1593_s3 }
   0x3   :  { %11 = vsyncpa [#allocation5], 0 }
   0x4   :  { %13 = vsyncpa [#allocation5 + $0x1], 0 }
   0x5   :  { %14 = vsyncpa [#allocation8], 0 }
   0x6   :  { %16 = vsyncpa [#allocation8 + $0x1], 0 }
   0x7   :  { %17 = vsyncpa [#allocation11], 0 }
   0x8   :  { %18 = vsyncpa [#allocation6], 0 }
   0x9   :  { %20 = vsyncpa [#allocation6 + $0x1], 0  ;;  %s1279_s21 = smov 0   ;;  %s1281_s22 = smov 0  }
   0xa   :  { %s1283_s23 = smov 0   ;;  %s1285_s24 = smov 0  }
   0xb   :  { %s1287_s25 = smov 0   ;;  %s1289_s26 = smov 0  }
   0xc LB: > { %1605 = sst [smem:[#allocation18_spill]] %s1227_s25  ;;  %s1310_s27 = sadd.s32 4294967295, %s1231_s26   ;;  %s1231_s26 = sphi %s1289_s26, %s26_s26   ;;  %s1227_s25 = sphi %s1287_s25, %s1628_s25   ;;  %s1223_s24 = sphi %s1285_s24, %s1627_s24   ;;  %s1219_s23 = sphi %s1283_s23, %s1631_s23   ;;  %s1215_s22 = sphi %s1281_s22, %s1630_s22   ;;  %s1211_s21 = sphi %s1279_s21, %s1629_s21  }
   0xd   : > { %s843_s28 = sadd.s32 4294967294, %s1231_s26   ;;  %p67_p0 = scmp.ne.s32.totalorder %s1215_s22, %s1211_s21 }
   0xe   : > { %p1597_p1 = scmp.eq.s32.totalorder %s1310_s27, 0  ;;  %p211_p3 = scmp.eq.s32.totalorder %s843_s28, 1 }
   0xf   : > { %p844_p5 = scmp.ge.s32.totalorder %s1231_s26, 1  ;;  %p218_p7 = scmp.lt.s32.totalorder %s1231_s26, 3 }
  0x10   : > { %p1319_p4 = por %p1597_p1, %p67_p0  ;;  %p1324_p6 = por %p211_p3, %p67_p0 }
  0x11   : > { %p1329_p8 = pnand %p844_p5, %p218_p7  ;;  %s1233_s8 = smov [#allocation9]  }
  0x12   : > { %s1606_s29 = scalar_select %p1319_p4, 1, 0 }
  0x13   : > { %s1607_s30 = scalar_select %p1324_p6, 1, 0 }
  0x14   : > { %s1608_s7 = scalar_select %p1329_p8, 1, 0 }
  0x15   : > { %s230_s9 = sshll.u32 %s1233_s8, 4  ;;  %p941_p9 = pneg %p1329_p8  ;;  %s1333_s9 = int_to_ptr.vmem [resolvable:$true] %s230_s9 }
  0x16   : > { %s1234_s11 = smov [#allocation10]   ;;  %s1610_s2 = sld [smem:[#allocation21_spill]] }
  0x17   : > { %p1340_p11 = pnand %p941_p9, %p1597_p1  ;;  %s243_s12 = sshll.u32 %s1234_s11, 4  ;;  %s1344_s12 = int_to_ptr.vmem [resolvable:$true] %s243_s12 }
  0x19   : > { %p1023_p13 = pneg %p1340_p11 }
  0x1c   : > { %s1021_s15 = scalar_lea.hbm %s1610_s2, 512 }
  0x1d   : > { %p1022_p12 = scmp.ne.s32.totalorder %s1610_s2, %s1021_s15  ;;  %p1028_p5 = scmp.lt.u32.totalorder %s1021_s15, %s1610_s2 }
  0x1f   : > { %p1024_p0 = pnand %p1023_p13, %p1022_p12 }
  0x21   : > { %p1025_p3 = pneg %p1024_p0 }
  0x23   : > { %p1030_p7 = pnand %p1028_p5, %p1025_p3 }
  0x25   : > { %1033 = shalt.err (!%p1030_p7)
}
  0x26   : > { %s1034_s20 = scalar_lea.vmem %s1333_s9, 512  ;;  %p1042_p2 = scmp.lt.s32.totalorder %s1333_s9, %s1333_s9 }
  0x27   : > { %p1035_p9 = scmp.ne.s32.totalorder %s1333_s9, %s1034_s20  ;;  %p1043_p12 = scmp.lt.s32.totalorder %s1034_s20, %s1034_s20 }
  0x29   : > { %p1037_p10 = pnand %p1035_p9, %p1023_p13  ;;  %p1044_p0 = por %p1043_p12, %p1042_p2 }
  0x2b   : > { %p1038_p1 = pneg %p1037_p10 }
  0x2d   : > { %p1045_p6 = pnand %p1044_p0, %p1038_p1 }
  0x2f   : > { %1048 = shalt.err (!%p1045_p6)
}
  0x30   : > { %s1235_s28 = smov 128   ;;  %s1236_s8 = smov 8  }
  0x31   : > { %944 = dma.hbm_to_vmem [thread:$0]  (!%p1340_p11), %s1610_s2, 512, %s1333_s9, [#allocation8], %s1235_s28, %s1235_s28, %s1236_s8  }
  0x32   : > { %s1611_s3 = sld [smem:[#allocation22_spill]] }
  0x38   : > { %s1049_s16 = scalar_lea.hbm %s1611_s3, 512 }
  0x39   : > { %p1050_p2 = scmp.ne.s32.totalorder %s1611_s3, %s1049_s16  ;;  %p1056_p10 = scmp.lt.u32.totalorder %s1049_s16, %s1611_s3 }
  0x3b   : > { %p1052_p1 = pnand %p1050_p2, %p1023_p13 }
  0x3d   : > { %p1053_p6 = pneg %p1052_p1 }
  0x3f   : > { %p1058_p3 = pnand %p1056_p10, %p1053_p6 }
  0x41   : > { %1061 = shalt.err (!%p1058_p3)
}
  0x42   : > { %s1062_s9 = scalar_lea.vmem %s1344_s12, 512  ;;  %p1070_p12 = scmp.lt.s32.totalorder %s1344_s12, %s1344_s12 }
  0x43   : > { %p1063_p5 = scmp.ne.s32.totalorder %s1344_s12, %s1062_s9  ;;  %p1071_p0 = scmp.lt.s32.totalorder %s1062_s9, %s1062_s9 }
  0x45   : > { %p1065_p7 = pnand %p1063_p5, %p1023_p13  ;;  %p1072_p2 = por %p1071_p0, %p1070_p12 }
  0x47   : > { %p1066_p9 = pneg %p1065_p7 }
  0x49   : > { %p1073_p1 = pnand %p1072_p2, %p1066_p9 }
  0x4b   : > { %1076 = shalt.err (!%p1073_p1)
}
  0x4c   : > { %947 = dma.hbm_to_vmem [thread:$0]  (!%p1340_p11), %s1611_s3, 512, %s1344_s12, [#allocation11], %s1235_s28, %s1235_s28, %s1236_s8  }
  0x4d   : > { %s45_s14 = sadd.s32 1, %s1227_s25  ;;  %s54_s15 = sadd.s32 1, %s1219_s23 }
  0x4e   : > { %p47_p13 = scmp.ge.s32.totalorder %s45_s14, 2  ;;  %p61_p6 = scmp.ne.s32.totalorder %s1219_s23, %s1215_s22 }
  0x4f   : > { %p62_p10 = scmp.eq.s32.totalorder %s1231_s26, 0  ;;  %p961_p3 = scmp.lt.s32.totalorder %s1231_s26, 2 }
  0x50   : > { %s1633_s14 = smov (%p47_p13, %s45_s14), 0  ;;  %p1613_p7 = scmp.eq.s32.totalorder %s1310_s27, 1 }
  0x51   : > { %1612 = sst [smem:[#allocation19_spill]] %s1633_s14  ;;  %p63_p5 = por %p62_p10, %p61_p6 }
  0x52   : > { %p1408_p9 = por %p1613_p7, %p61_p6  ;;  %s49_s16 = ssub.s32 %s1227_s25, %s1633_s14 }
  0x53   : > { %s263_s17 = sand.u32 1, %s1219_s23   ;;  %p52_p12 = scmp.eq.s32.totalorder %s49_s16, 0 }
  0x54   : > { %s1614_s10 = scalar_select %p1408_p9, 1, 0 }
  0x55   : > { %s1415_s12 = sshll.u32 %s263_s17, 3  ;;  %s849_s28 = sshll.u32 %s1227_s25, 7 }
  0x56   : > { %s1419_s8 = scalar_select %p52_p12, %s1219_s23, %s54_s15  }
  0x57   : > { %s1424_s20 = scalar_lea.hbm %s1590_s0, %s849_s28  ;;  %s267_s9 = scalar_lea.vmem [#allocation4], %s1415_s12 }
  0x58   : > { %1615 = sst [smem:[#allocation20_spill]] %s1419_s8  ;;  %s275_s11 = sshll.u32 %s267_s9, 4  ;;  %s1433_s11 = int_to_ptr.vmem [resolvable:$true] %s275_s11 }
  0x59   : > { %p1429_p11 = pnand %p961_p3, %p63_p5  ;;  %s1438_s18 = scalar_lea.hbm %s1591_s1, %s849_s28 }
  0x5a   : > { %s264_s19 = scalar_lea.sflag [#allocation5], %s263_s17  ;;  %s1077_s2 = scalar_lea.hbm %s1424_s20, 128 }
  0x5b   : > { %p1078_p0 = scmp.ne.s32.totalorder %s1424_s20, %s1077_s2  ;;  %p1079_p2 = pneg %p1429_p11 }
  0x5c   : > { %s1082_s14 = scalar_lea.hbm %s1590_s0, 256  ;;  %p1083_p6 = scmp.lt.u32.totalorder %s1424_s20, %s1590_s0 }
  0x5d   : > { %p1080_p1 = pnand %p1079_p2, %p1078_p0  ;;  %p1084_p10 = scmp.lt.u32.totalorder %s1082_s14, %s1077_s2 }
  0x5e   : > { %p1086_p5 = scmp.lt.u32.totalorder %s1077_s2, %s1424_s20 }
  0x5f   : > { %p1081_p13 = pneg %p1080_p1  ;;  %p1085_p3 = por %p1084_p10, %p1083_p6 }
  0x61   : > { %p1087_p7 = por %p1086_p5, %p1085_p3 }
  0x63   : > { %p1088_p12 = pnand %p1087_p7, %p1081_p13 }
  0x65   : > { %1091 = shalt.err (!%p1088_p12)
}
  0x66   : > { %s1092_s17 = scalar_lea.vmem %s1433_s11, 128  ;;  %s1237_s3 = smov [#allocation4]  }
  0x67   : > { %p1093_p0 = scmp.ne.s32.totalorder %s1433_s11, %s1092_s17  ;;  %s1097_s28 = sshll.u32 %s1237_s3, 4  ;;  %s1098_s28 = int_to_ptr.vmem [resolvable:$false] %s1097_s28 }
  0x68   : > { %s1099_s25 = scalar_lea.vmem %s1098_s28, 256  ;;  %p1100_p4 = scmp.lt.s32.totalorder %s1433_s11, %s1098_s28 }
  0x69   : > { %p1095_p1 = pnand %p1093_p0, %p1079_p2  ;;  %p1101_p6 = scmp.lt.s32.totalorder %s1099_s25, %s1092_s17 }
  0x6b   : > { %p1096_p9 = pneg %p1095_p1  ;;  %p1102_p10 = por %p1101_p6, %p1100_p4 }
  0x6d   : > { %p1103_p3 = pnand %p1102_p10, %p1096_p9 }
  0x6f   : > { %1106 = shalt.err (!%p1103_p3)
}
  0x70   : > { %951 = dma.hbm_to_vmem [thread:$0]  (!%p1429_p11), %s1424_s20, 128, %s1433_s11, %s264_s19  }
  0x71   : > { %s282_s2 = sand.u32 1, %s1231_s26   ;;  %s286_s14 = scalar_lea.vmem [#allocation7], %s1415_s12 }
  0x72   : > { %s294_s8 = sshll.u32 %s286_s14, 4  ;;  %s283_s15 = scalar_lea.sflag [#allocation8], %s282_s2  ;;  %s295_s8 = int_to_ptr.vmem [resolvable:$true] %s294_s8 }
  0x73   : > { %s1107_s16 = scalar_lea.hbm %s1438_s18, 128  ;;  %s1112_s3 = scalar_lea.hbm %s1591_s1, 256 }
  0x74   : > { %p1108_p4 = scmp.ne.s32.totalorder %s1438_s18, %s1107_s16  ;;  %p1113_p5 = scmp.lt.u32.totalorder %s1438_s18, %s1591_s1 }
  0x75   : > { %p1114_p7 = scmp.lt.u32.totalorder %s1112_s3, %s1107_s16  ;;  %p1116_p0 = scmp.lt.u32.totalorder %s1107_s16, %s1438_s18 }
  0x76   : > { %p1110_p9 = pnand %p1108_p4, %p1079_p2 }
  0x77   : > { %p1115_p12 = por %p1114_p7, %p1113_p5 }
  0x78   : > { %p1111_p13 = pneg %p1110_p9 }
  0x79   : > { %p1117_p1 = por %p1116_p0, %p1115_p12 }
  0x7b   : > { %p1118_p6 = pnand %p1117_p1, %p1111_p13 }
  0x7d   : > { %1121 = shalt.err (!%p1118_p6)
}
  0x7e   : > { %s1122_s12 = scalar_lea.vmem %s295_s8, 128  ;;  %s1238_s20 = smov [#allocation7]  }
  0x7f   : > { %p1123_p10 = scmp.ne.s32.totalorder %s295_s8, %s1122_s12  ;;  %s1127_s11 = sshll.u32 %s1238_s20, 4  ;;  %s1128_s11 = int_to_ptr.vmem [resolvable:$false] %s1127_s11 }
  0x80   : > { %s1129_s19 = scalar_lea.vmem %s1128_s11, 256  ;;  %p1130_p9 = scmp.lt.s32.totalorder %s295_s8, %s1128_s11 }
  0x81   : > { %p1125_p3 = pnand %p1123_p10, %p1079_p2  ;;  %p1131_p8 = scmp.lt.s32.totalorder %s1129_s19, %s1122_s12 }
  0x83   : > { %p1126_p4 = pneg %p1125_p3  ;;  %p1132_p5 = por %p1131_p8, %p1130_p9 }
  0x85   : > { %p1133_p7 = pnand %p1132_p5, %p1126_p4 }
  0x87   : > { %1136 = shalt.err (!%p1133_p7)
}
  0x88   : > { %954 = dma.hbm_to_vmem [thread:$0]  (!%p1429_p11), %s1438_s18, 128, %s295_s8, %s283_s15  }
  0x89   : > { %p1617_p13 = scmp.ne.s32.totalorder %s1608_s7, 0 }
  0x8a   : > { %s1489_s2 = sand.u32 (!%p1617_p13), 1, %s1215_s22   ;;  %p1618_p8 = scmp.ne.s32.totalorder (!%p1617_p13), %s1606_s29, 0 }
  0x8b   : > { %303 = sbr.rel (%p1617_p13) target bundleno = 840 (0x348), region = 44  ;;  %s1492_s14 = sshll.u32 (!%p1617_p13), %s1489_s2, 3 }
  0x8c   : > { %s306_s16 = scalar_lea.sflag (!%p1617_p13), [#allocation5], %s1489_s2  ;;  %s309_s9 = scalar_lea.vmem (!%p1617_p13), [#allocation4], %s1492_s14 }
  0x92   : > { %1190 = dma.done.wait (%p1618_p8), %s306_s16, 128  }
  0x93   : > { %1192 = vsyncadd (%p1618_p8), %s306_s16, 4294967168  ;;  %s314_s7 = sand.u32 1, %s1310_s27   ;;  %s318_s18 = scalar_lea.vmem [#allocation7], %s1492_s14 }
  0x94   : > { %s315_s13 = scalar_lea.sflag [#allocation8], %s314_s7 }
  0x95   : > { %1194 = dma.done.wait (%p1618_p8), %s315_s13, 128  }
  0x96   : > { %1196 = vsyncadd (%p1618_p8), %s315_s13, 4294967168  ;;  %p1619_p11 = scmp.eq.s32.totalorder %s1310_s27, 0 }
  0x98   : > { %1198 = dma.done.wait (%p1619_p11), [#allocation8], 512   ;;  %p1620_p2 = pmov %p1619_p11 }
  0x9a   : > { %1200 = vsyncadd (%p1620_p2), [#allocation8], 4294966784  ;;  %p1621_p12 = pmov %p1620_p2 }
  0x9b   : > { %p1622_p0 = pmov %p1620_p2 }
  0x9c   : > { %1202 = dma.done.wait (%p1621_p12), [#allocation11], 512  }
  0x9d   : > { %1204 = vsyncadd (%p1622_p0), [#allocation11], 4294966784  ;;  %vm376_vm0 = vcmask 261120   ;;  %v1239_v0 = vmov 0.0|0.0   ;;  %v1240_v1 = vmov 0.0   ;;  %vm1241_vm1 = vmmov 0  }
  0x9e   : > { %915 = vmatprep.subr.bf16.mxu0 %v1239_v0  ;;  %921 = vmatprep.subr.bf16.mxu1 %v1239_v0  ;;  %452 = vst.msk [vmem:[#allocation3] sm:$0xff] %vm376_vm0, %v1240_v1  ;;  %v365_v2 = vld [vmem:[#allocation9] sm:$0xff]  ;;  %v366_v3 = vld [vmem:[#allocation9 + $0x8] sm:$0xff]  ;;  %v367_v4 = vld [vmem:[#allocation9 + $0x10] sm:$0xff]  ;;  %s1242_s17 = smov 96   ;;  %vm620_vm2 = vcmask 64512  }
  0x9f   : > { %891 = vmatprep.mubr.msk.f32.mxu0 %vm1241_vm1, %v1240_v1  ;;  %902 = vmatprep.mubr.msk.f32.mxu1 %vm1241_vm1, %v1240_v1  ;;  %v916_v5 = vpack.c.bf16 %v366_v3, %v365_v2  ;;  %v368_v6 = vld [vmem:[#allocation9 + $0x18] sm:$0xff]  ;;  %v454_v7 = vld [vmem:[#allocation10] sm:$0xff]  ;;  %v455_v8 = vld [vmem:[#allocation10 + $0x8] sm:$0xff]  ;;  %s866_s3 = sshll.u32 %s1223_s24, 7  ;;  %s359_s28 = scalar_lea.vmem [#allocation12], %s1492_s14 }
  0xa0   : > { %v922_v9 = vpack.c.bf16 %v455_v8, %v454_v7  ;;  %v456_v10 = vld [vmem:[#allocation10 + $0x10] sm:$0xff]  ;;  %v457_v11 = vld [vmem:[#allocation10 + $0x18] sm:$0xff]  ;;  %v919_v12 = vpack.c.bf16 %v368_v6, %v367_v4  ;;  %v364_v14 = vld [vmem:[%s309_s9] sm:$0xff]  ;;  %s716_s25 = sshll.u32 %s359_s28, 4  ;;  %s1540_s11 = scalar_lea.hbm %s1596_s6, %s866_s3  ;;  %s1542_s25 = int_to_ptr.vmem [resolvable:$true] %s716_s25 }
  0xa1   : > { %917 = vmatpush3.bf16.msra.mxu0 %v916_v5  ;;  %v925_v13 = vpack.c.bf16 %v457_v11, %v456_v10  ;;  %v453_v15 = vld [vmem:[%s318_s18] sm:$0xff]  ;;  %s702_s19 = scalar_lea.sflag [#allocation6], %s1489_s2  ;;  %s1137_s16 = scalar_lea.vmem %s1542_s25, 128 }
  0xa2   : > { %918 = vmatprep.subr.bf16.mxu0 %v1239_v0  ;;  %923 = vmatpush3.bf16.msra.mxu1 %v922_v9  ;;  %v858_v16 = vld [vmem:[%s1594_s4] ss:$0 sm:$0xff]  ;;  %p1138_p1 = scmp.ne.s32.totalorder %s1542_s25, %s1137_s16  ;;  %p1623_p6 = scmp.ne.s32.totalorder %s1614_s10, 0 }
  0xa3   : > { %924 = vmatprep.subr.bf16.mxu1 %v1239_v0  ;;  %v860_v17 = vld [vmem:[%s1595_s5] ss:$0 sm:$0xff]  ;;  %s1243_s24 = smov [#allocation12]  }
  0xa4   : > { %p1139_p10 = pnand %p1138_p1, %p1623_p6  ;;  %s1141_s14 = sshll.u32 %s1243_s24, 4  ;;  %s1142_s14 = int_to_ptr.vmem [resolvable:$false] %s1141_s14 }
  0xa5   : > { %920 = vmatpush3.bf16.msra.mxu0 %v919_v12  ;;  %v616_v29 = vld [vmem:[#allocation3] sm:$0xff]  ;;  %s1143_s9 = scalar_lea.vmem %s1142_s14, 256  ;;  %p1144_p4 = scmp.lt.s32.totalorder %s1542_s25, %s1142_s14 }
  0xa6   : > { %926 = vmatpush3.bf16.msra.mxu1 %v925_v13  ;;  %905 = vmatprep.subr.mxu0 %v1240_v1  ;;  %p1140_p3 = pneg %p1139_p10  ;;  %p1145_p9 = scmp.lt.s32.totalorder %s1143_s9, %s1137_s16 }
  0xa7   : > { %910 = vmatprep.subr.mxu1 %v1240_v1 }
  0xa8   : > { %892 = vmatmul.mubr.msk.f32.vlgmr.msra.gmra.mrb[0].mxu0 %vm376_vm0, %v364_v14  ;;  %p1146_p5 = por %p1145_p9, %p1144_p4 }
  0xa9   : > { %903 = vmatmul.mubr.msk.f32.vlgmr.msra.gmra.mrb[0].mxu1 %vm376_vm0, %v453_v15  ;;  %907 = vmatprep.mubr.msk.f32.mxu0 %vm1241_vm1, %v1240_v1 }
  0xaa   : > { %912 = vmatprep.mubr.msk.f32.mxu1 %vm1241_vm1, %v1240_v1  ;;  %p1147_p7 = pnand %p1146_p5, %p1140_p3 }
 0x17b   : > { %v446_v18 = vpop.f32.mrb[0].mxu0 }
 0x17c   : > { %v447_v19 = vadd.f32 %v858_v16, %v446_v18  ;;  %v893_v20 = vpop.f32.mrb[1].mxu0  ;;  %v535_v21 = vpop.f32.mrb[0].mxu1 }
 0x17d   : > { %v536_v22 = vadd.f32 %v860_v17, %v535_v21  ;;  %v904_v23 = vpop.f32.mrb[1].mxu1 }
 0x17e   : > { %v450_v24 = vmul.f32 0.17677669, %v447_v19 }
 0x17f   : > { %906 = vmatpush3.xpose.msk.msra.mxu0 %vm376_vm0, %v536_v22  ;;  %617 = vrot.lane.b32.xlu0 %v536_v22, %s1242_s17 }
 0x180   : > { %451 = vst.msk [vmem:[#allocation2] sm:$0xff] %vm376_vm0, %v450_v24 }
 0x187   : > { %v539_v25 = vld [vmem:[#allocation2] sm:$0xff] }
 0x188   : > { %908 = vmatmul.mubr.msk.f32.vlgmr.msra.gmra.mrb[2].mxu0 %vm376_vm0, %v539_v25 }
 0x1f1   : > { %v618_v26 = vpop.permute.xlu0 %617 }
 0x1f2   : > { %911 = vmatpush3.msra.mxu1 %v618_v26 }
 0x25b   : > { %v612_v27 = vpop.f32.mrb[2].mxu0 }
 0x25c   : > { %v909_v28 = vpop.f32.mrb[3].mxu0  ;;  %913 = vmatmul.mubr.msk.f32.vlgmr.msra.gmra.mrb[2].mxu1 %vm620_vm2, %v612_v27 }
 0x32f   : > { %v690_v30 = vpop.f32.mrb[2].mxu1 }
 0x330   : > { %v694_v31 = vadd.f32 %v690_v30, %v616_v29  ;;  %v914_v32 = vpop.f32.mrb[3].mxu1 }
 0x332   : > { %695 = vst.msk [vmem:[#allocation3] sm:$0xff] %vm376_vm0, %v694_v31 }
 0x339   : > { %v699_v33 = vld [vmem:[#allocation3] sm:$0xff] }
 0x33a   : > { %700 = vst.msk [vmem:[%s359_s28] sm:$0xff] %vm376_vm0, %v699_v33 }
 0x33b   : > { %1150 = shalt.err (!%p1147_p7)
}
 0x33c   : > { %s1151_s2 = scalar_lea.hbm %s1540_s11, 128  ;;  %s1155_s18 = scalar_lea.hbm %s1596_s6, 256 }
 0x33d   : > { %p1152_p13 = scmp.ne.s32.totalorder %s1540_s11, %s1151_s2  ;;  %p1156_p2 = scmp.lt.u32.totalorder %s1540_s11, %s1596_s6 }
 0x33e   : > { %p1157_p12 = scmp.lt.u32.totalorder %s1155_s18, %s1151_s2  ;;  %p1159_p1 = scmp.lt.u32.totalorder %s1151_s2, %s1540_s11 }
 0x33f   : > { %p1153_p8 = pnand %p1152_p13, %p1623_p6 }
 0x340   : > { %p1158_p0 = por %p1157_p12, %p1156_p2 }
 0x341   : > { %p1154_p11 = pneg %p1153_p8 }
 0x342   : > { %p1160_p10 = por %p1159_p1, %p1158_p0 }
 0x344   : > { %p1161_p3 = pnand %p1160_p10, %p1154_p11 }
 0x346   : > { %1164 = shalt.err (!%p1161_p3)
}
 0x347   : > { %939 = dma.vmem_to_hbm [thread:$0]  (%p1623_p6), %s1542_s25, 128, %s1540_s11, %s702_s19  }
 0x348 PF: > { %s728_s8 = sand.u32 1, %s1211_s21   ;;  %p1624_p4 = scmp.ne.s32.totalorder %s1607_s30, 0 }
 0x349   : > { %p1625_p9 = scmp.ge.s32.totalorder %s1231_s26, 2  ;;  %s729_s15 = scalar_lea.sflag [#allocation6], %s728_s8 }
 0x34b   : > { %p956_p5 = pnand %p1625_p9, %p1624_p4 }
 0x34d   : > { %1206 = dma.done.wait (!%p956_p5), %s729_s15, 128  }
 0x34e   : > { %1208 = vsyncadd (!%p956_p5), %s729_s15, 4294967168  ;;  %s26_s26 = sadd.s32 1, %s1231_s26   ;;  %s1626_s10 = sld [smem:[#allocation20_spill]] }
 0x34f   : > { %p23_p7 = scmp.ge.s32.totalorder %s26_s26, 4   ;;  %s1627_s24 = sld [smem:[#allocation18_spill]] }
 0x350   : > { %s1628_s25 = sld [smem:[#allocation19_spill]]  ;;  %s1629_s21 = smov %s1215_s22 }
 0x351   : > { %s1630_s22 = smov %s1219_s23  ;;  %25 = sbr.rel (!%p23_p7) target bundleno = 12 (0xc), region = 118 }
 0x354   : > { %s1631_s23 = smov %s1626_s10 }
 0x358   :  { %734 = vsyncpa [#allocation5], 1 }
 0x359   :  { %736 = vsyncpa [#allocation5 + $0x1], 1 }
 0x35a   :  { %737 = vsyncpa [#allocation8], 1 }
 0x35b   :  { %739 = vsyncpa [#allocation8 + $0x1], 1 }
 0x35c   :  { %740 = vsyncpa [#allocation11], 1 }
 0x35d   :  { %741 = vsyncpa [#allocation6], 1 }
 0x35e   :  { %743 = vsyncpa [#allocation6 + $0x1], 1 }

</bundles_post_ra>
